<compile_context>
chip_gen: v7x
topology: tpu7x:2x2x1
jax: 0.10.0
libtpu: 0.0.40
codegen_flags: <defaults>
</compile_context>

<pallas_src>
import jax
import jax.numpy as jnp
from jax.experimental import pallas as pl
from jax.experimental.pallas import tpu as pltpu

KH, KW = 3, 3  # fixed 3x3 kernel of the wrapped Conv2d


def _conv3x3_kernel(col_ref, w_ref, b_ref, o_ref):
    """Single grid step covering the whole (small) problem.

    col_ref: (N, K, H*W)   im2col input, K = Cin*KH*KW, lanes = H*W (dense)
    w_ref  : (Cout, K)     flattened weights (matches col's K ordering)
    b_ref  : (Cout, 1)     bias
    o_ref  : (N, Cout, H*W) output in NCHW-flattened layout, lanes = H*W (dense)
    """
    n_batch = o_ref.shape[0]
    w = w_ref[...]                      # (Cout, K)
    b = b_ref[...].astype(jnp.float32)  # (Cout, 1), broadcast over lanes
    for n in range(n_batch):            # static unroll; N is tiny
        acc = jax.lax.dot_general(
            w, col_ref[n],
            dimension_numbers=(((1,), (0,)), ((), ())),
            preferred_element_type=jnp.float32,
        )                               # (Cout, H*W), one MXU contraction
        o_ref[n] = (acc + b).astype(o_ref.dtype)


@jax.jit
def conv3x3_same_pallas(x_nchw, weight_oihw, bias):
    """3x3 stride-1 'same' conv with bias, matching nn.Conv2d(padding=1).

    x_nchw:      (N, Cin, H, W)
    weight_oihw: (Cout, Cin, 3, 3)   (PyTorch layout)
    bias:        (Cout,)
    returns:     (N, Cout, H, W)
    """
    N, Cin, H, W = x_nchw.shape
    Cout = weight_oihw.shape[0]
    K = Cin * KH * KW
    M = H * W

    # Wrapper-side glue (XLA): zero pad + im2col into a matmul-ready operand.
    # col[n, cin*9 + kh*3 + kw, h*W + w] = x_pad[n, cin, h + kh, w + kw]
    x_pad = jnp.pad(x_nchw, ((0, 0), (0, 0), (1, 1), (1, 1)))
    taps = [x_pad[:, :, kh:kh + H, kw:kw + W].reshape(N, Cin, M)
            for kh in range(KH) for kw in range(KW)]
    col = jnp.stack(taps, axis=2).reshape(N, K, M)           # (N, K, H*W)
    w_flat = weight_oihw.reshape(Cout, K)                    # same (cin,kh,kw) order
    b2 = bias.reshape(Cout, 1)

    out = pl.pallas_call(
        _conv3x3_kernel,
        out_shape=jax.ShapeDtypeStruct((N, Cout, M), x_nchw.dtype),
        grid_spec=pltpu.PrefetchScalarGridSpec(
            num_scalar_prefetch=0,
            grid=(1,),  # whole problem in one step (no per-step pipeline overhead)
            in_specs=[
                pl.BlockSpec((N, K, M), lambda i: (0, 0, 0)),
                pl.BlockSpec((Cout, K), lambda i: (0, 0)),
                pl.BlockSpec((Cout, 1), lambda i: (0, 0)),
            ],
            out_specs=pl.BlockSpec((N, Cout, M), lambda i: (0, 0, 0)),
        ),
        compiler_params=pltpu.CompilerParams(
            dimension_semantics=("arbitrary",),
            # Let XLA fuse the im2col producer into the pallas call instead of
            # materializing `col` in HBM (hint; harmless if not applied).
            allow_input_fusion=[True, False, False],
        ),
    )(col, w_flat, b2)

    # (N, Cout, H*W) -> (N, Cout, H, W): pure reshape, no transpose needed.
    return out.reshape(N, Cout, H, W)


class L1:
    """JAX port of the L1 wrapper: forward just delegates to the wrapped module.

    The PyTorch backward hook replaces each param's grad with
    weight_decay * sign(param); that is training-time-only and does not change
    the forward pass.  `regularize` is provided for parity.
    """

    def __init__(self, module_fn, weight_decay):
        self.module_fn = module_fn
        self.weight_decay = weight_decay
        # TODO(synk): backward-hook gradient replacement has no forward-pass
        # Pallas equivalent; it would be applied in the optimizer/custom-VJP.

    def regularize(self, parameter):
        return self.weight_decay * jnp.sign(parameter)

    def __call__(self, *args, **kwargs):
        return self.module_fn(*args, **kwargs)


if __name__ == "__main__":
    key = jax.random.PRNGKey(0)
    kx, kw, kb = jax.random.split(key, 3)

    N, Cin, H, W = 2, 4, 16, 16
    Cout = 4

    x = jax.random.normal(kx, (N, Cin, H, W), dtype=jnp.float32)
    # Deterministic parameter init (shapes match nn.Conv2d(4, 4, 3, padding=1)).
    weight = 0.1 * jax.random.normal(kw, (Cout, Cin, KH, KW), dtype=jnp.float32)
    bias = 0.1 * jax.random.normal(kb, (Cout,), dtype=jnp.float32)

    wrapped = L1(lambda inp: conv3x3_same_pallas(inp, weight, bias),
                 weight_decay=1e-4)

    out = wrapped(x)
    out = jax.block_until_ready(out)

    # Cross-check against XLA's conv (pure JAX reference).
    ref = jax.lax.conv_general_dilated(
        x, weight, window_strides=(1, 1), padding="SAME",
        dimension_numbers=("NCHW", "OIHW", "NCHW"),
    ) + bias.reshape(1, Cout, 1, 1)
    assert out.shape == (N, Cout, H, W)
    assert jnp.allclose(out, ref, atol=1e-4, rtol=1e-4)

    print("KERNEL_OK")
</pallas_src>

<mosaic_0001>
module attributes {stable_mosaic.version = 11 : i64} {
  func.func @_conv3x3_kernel(%arg0: i32, %arg1: memref<2x36x256xf32, #tpu.memory_space<vmem>>, %arg2: memref<4x36xf32, #tpu.memory_space<vmem>>, %arg3: memref<4x1xf32, #tpu.memory_space<vmem>>, %arg4: memref<2x4x256xf32, #tpu.memory_space<vmem>>) attributes {dimension_semantics = [#tpu.dimension_semantics<arbitrary>], iteration_bounds = array<i64: 1>, scalar_prefetch = 0 : i64, scratch_operands = 0 : i64, tpu.core_type = #tpu.core_type<tc>, window_params = [{pipeline_mode = #tpu.pipeline_mode<synchronous>, transform_indices = @transform_0, window_bounds = array<i64: 2, 36, 256>}, {pipeline_mode = #tpu.pipeline_mode<synchronous>, transform_indices = @transform_1, window_bounds = array<i64: 4, 36>}, {pipeline_mode = #tpu.pipeline_mode<synchronous>, transform_indices = @transform_2, window_bounds = array<i64: 4, 1>}, {pipeline_mode = #tpu.pipeline_mode<synchronous>, transform_indices = @transform_3, window_bounds = array<i64: 2, 4, 256>}]} {
    %c0 = arith.constant 0 : index
    %c0_0 = arith.constant 0 : index
    %0 = vector.load %arg2[%c0, %c0_0] : memref<4x36xf32, #tpu.memory_space<vmem>>, vector<4x36xf32>
    %c0_1 = arith.constant 0 : index
    %c0_2 = arith.constant 0 : index
    %1 = vector.load %arg3[%c0_1, %c0_2] : memref<4x1xf32, #tpu.memory_space<vmem>>, vector<4x1xf32>
    %c0_3 = arith.constant 0 : index
    %c0_4 = arith.constant 0 : index
    %c0_5 = arith.constant 0 : index
    %2 = vector.load %arg1[%c0_3, %c0_4, %c0_5] : memref<2x36x256xf32, #tpu.memory_space<vmem>>, vector<1x36x256xf32>
    %3 = vector.shape_cast %2 : vector<1x36x256xf32> to vector<36x256xf32>
    %cst = arith.constant dense<0.000000e+00> : vector<4x256xf32>
    %4 = tpu.matmul %0, %3, %cst {dimension_numbers = #tpu.dot_dimension_numbers<[1], [0], [0], [1], [0, 0, 1, 1], [], []>} : vector<4x36xf32>, vector<36x256xf32>, vector<4x256xf32> -> vector<4x256xf32>
    %5 = vector.broadcast %1 : vector<4x1xf32> to vector<4x256xf32>
    %6 = arith.addf %4, %5 : vector<4x256xf32>
    %c0_6 = arith.constant 0 : index
    %c0_7 = arith.constant 0 : index
    %c0_8 = arith.constant 0 : index
    %7 = vector.load %arg4[%c0_6, %c0_7, %c0_8] : memref<2x4x256xf32, #tpu.memory_space<vmem>>, vector<1x4x256xf32>
    %8 = vector.shape_cast %7 : vector<1x4x256xf32> to vector<4x256xf32>
    %9 = vector.shape_cast %6 : vector<4x256xf32> to vector<1x4x256xf32>
    tpu.vector_store %arg4[%c0_6, %c0_7, %c0_8], %9 {strides = array<i32>} : memref<2x4x256xf32, #tpu.memory_space<vmem>>, vector<1x4x256xf32>,
    %c1 = arith.constant 1 : index
    %c0_9 = arith.constant 0 : index
    %c0_10 = arith.constant 0 : index
    %10 = vector.load %arg1[%c1, %c0_9, %c0_10] : memref<2x36x256xf32, #tpu.memory_space<vmem>>, vector<1x36x256xf32>
    %11 = vector.shape_cast %10 : vector<1x36x256xf32> to vector<36x256xf32>
    %cst_11 = arith.constant dense<0.000000e+00> : vector<4x256xf32>
    %12 = tpu.matmul %0, %11, %cst_11 {dimension_numbers = #tpu.dot_dimension_numbers<[1], [0], [0], [1], [0, 0, 1, 1], [], []>} : vector<4x36xf32>, vector<36x256xf32>, vector<4x256xf32> -> vector<4x256xf32>
    %13 = vector.broadcast %1 : vector<4x1xf32> to vector<4x256xf32>
    %14 = arith.addf %12, %13 : vector<4x256xf32>
    %c1_12 = arith.constant 1 : index
    %c0_13 = arith.constant 0 : index
    %c0_14 = arith.constant 0 : index
    %15 = vector.load %arg4[%c1_12, %c0_13, %c0_14] : memref<2x4x256xf32, #tpu.memory_space<vmem>>, vector<1x4x256xf32>
    %16 = vector.shape_cast %15 : vector<1x4x256xf32> to vector<4x256xf32>
    %17 = vector.shape_cast %14 : vector<4x256xf32> to vector<1x4x256xf32>
    tpu.vector_store %arg4[%c1_12, %c0_13, %c0_14], %17 {strides = array<i32>} : memref<2x4x256xf32, #tpu.memory_space<vmem>>, vector<1x4x256xf32>,
    return
  }
  func.func @transform_0(%arg0: i32) -> (i32, i32, i32) {
    %c0_i32 = arith.constant 0 : i32
    %c0_i32_0 = arith.constant 0 : i32
    %c0_i32_1 = arith.constant 0 : i32
    %c0_i32_2 = arith.constant 0 : i32
    return %c0_i32, %c0_i32_0, %c0_i32_1 : i32, i32, i32
  }
  func.func @transform_1(%arg0: i32) -> (i32, i32) {
    %c0_i32 = arith.constant 0 : i32
    %c0_i32_0 = arith.constant 0 : i32
    %c0_i32_1 = arith.constant 0 : i32
    return %c0_i32, %c0_i32_0 : i32, i32
  }
  func.func @transform_2(%arg0: i32) -> (i32, i32) {
    %c0_i32 = arith.constant 0 : i32
    %c0_i32_0 = arith.constant 0 : i32
    %c0_i32_1 = arith.constant 0 : i32
    return %c0_i32, %c0_i32_0 : i32, i32
  }
  func.func @transform_3(%arg0: i32) -> (i32, i32, i32) {
    %c0_i32 = arith.constant 0 : i32
    %c0_i32_0 = arith.constant 0 : i32
    %c0_i32_1 = arith.constant 0 : i32
    %c0_i32_2 = arith.constant 0 : i32
    return %c0_i32, %c0_i32_0, %c0_i32_1 : i32, i32, i32
  }
}

</mosaic_0001>

<bundles_post_ra>
// kernel: conv3x3_same_pallas.1
= control target key start
LH: loop header
LB: loop body
LE: loop exit
PB: predicated region body
PF: predicated region fallthrough
CT: control target
= control target key end

     0   :  { %v252_v3 = vmov 0.0   ;;  %v253_v8 = vmov 0   ;;  %vm35_vm0 = vcmask 1043456   ;;  %vm31_vm1 = vcmask 293888   ;;  %s346_s0 = inlined_call_operand.vmem [shape: f32[2,36,256], index: 0, kind: input, shape index: {}]   ;;  %s347_s2 = inlined_call_operand.vmem [shape: f32[4,1], index: 2, kind: input, shape index: {}]   ;;  %s348_s1 = inlined_call_operand.vmem [shape: f32[4,36], index: 1, kind: input, shape index: {}]   ;;  %s349_s3 = inlined_call_operand.vmem [shape: f32[2,4,256], index: 3, kind: output, shape index: {}]  }
   0x1   :  { %v17_v0 = vld [vmem:[%s346_s0 + $0x8] sm:$0xff]  ;;  %v19_v1 = vld [vmem:[%s346_s0 + $0x18] sm:$0xff]  ;;  %106 = vmatprep.mubr.f32.mxu0 %v252_v3  ;;  %199 = vmatprep.mubr.f32.mxu1 %v252_v3  ;;  %v16_v6 = vld [vmem:[%s346_s0] sm:$0xff] }
   0x2   :  { %v220_v2 = vld [vmem:[%s346_s0 + $0x58] sm:$0xff]  ;;  %v233_v4 = vpack.c.bf16 %v19_v1, %v17_v0  ;;  %v222_v5 = vld [vmem:[%s346_s0 + $0x68] sm:$0xff]  ;;  %v18_v7 = vld [vmem:[%s346_s0 + $0x10] sm:$0xff]  ;;  %251 = vset.pattern.permute.xlu0 %v253_v8 }
   0x3   :  { %v241_v9 = vpack.c.bf16 %v222_v5, %v220_v2  ;;  %v235_v10 = vpack.c.bf16 %v18_v7, %v16_v6  ;;  %v219_v11 = vld [vmem:[%s346_s0 + $0x50] sm:$0xff]  ;;  %v221_v12 = vld [vmem:[%s346_s0 + $0x60] sm:$0xff]  ;;  %v21_v13 = vld [vmem:[%s346_s0 + $0x28] sm:$0xff] }
   0x4   :  { %234 = vmatprep.subr.bf16.mxu0 %v233_v4  ;;  %v243_v14 = vpack.c.bf16 %v221_v12, %v219_v11  ;;  %v23_v15 = vld [vmem:[%s346_s0 + $0x38] sm:$0xff]  ;;  %v226_v17 = vld [vmem:[%s346_s0 + $0x88] sm:$0xff]  ;;  %v20_v20 = vld [vmem:[%s346_s0 + $0x20] sm:$0xff] }
   0x5   :  { %v224_v16 = vld [vmem:[%s346_s0 + $0x78] sm:$0xff]  ;;  %242 = vmatprep.subr.bf16.mxu1 %v241_v9  ;;  %236 = vmatpush1.bf16.msra.mxu0 %v235_v10  ;;  %v237_v18 = vpack.c.bf16 %v23_v15, %v21_v13  ;;  %v22_v21 = vld [vmem:[%s346_s0 + $0x30] sm:$0xff]  ;;  %v225_v24 = vld [vmem:[%s346_s0 + $0x80] sm:$0xff] }
   0x6   :  { %v245_v19 = vpack.c.bf16 %v226_v17, %v224_v16  ;;  %v223_v22 = vld [vmem:[%s346_s0 + $0x70] sm:$0xff]  ;;  %244 = vmatpush1.bf16.msra.mxu1 %v243_v14  ;;  %v239_v23 = vpack.c.bf16 %v22_v21, %v20_v20  ;;  %v25_v26 = vld [vmem:[%s346_s0 + $0x48] sm:$0xf]  ;;  %v228_v27 = vld [vmem:[%s346_s0 + $0x98] sm:$0xf] }
   0x7   :  { %238 = vmatprep.subr.bf16.mxu0 %v237_v18  ;;  %v247_v25 = vpack.c.bf16 %v225_v24, %v223_v22  ;;  %v15_v28 = vld [vmem:[%s347_s2] sm:$0xf]  ;;  %v227_v30 = vld [vmem:[%s346_s0 + $0x90] sm:$0xf] }
   0x8   :  { %246 = vmatprep.subr.bf16.mxu1 %v245_v19  ;;  %28 = vperm.xlu0 %251, %v15_v28   ;;  %v24_v29 = vld [vmem:[%s346_s0 + $0x40] sm:$0xf] }
   0x9   :  { %240 = vmatpush1.bf16.msra.mxu0 %v239_v23  ;;  %v14_v31 = vld [vmem:[%s348_s1] sm:$0xf] }
   0xa   :  { %248 = vmatpush1.bf16.msra.mxu1 %v247_v25  ;;  %216 = vmatprep.subr.msk.mxu0 %vm35_vm0, %v25_v26 }
   0xb   :  { %229 = vmatprep.subr.msk.mxu1 %vm35_vm0, %v228_v27 }
   0xd   :  { %217 = vmatpush1.msk.msra.mxu0 %vm35_vm0, %v24_v29 }
   0xe   :  { %230 = vmatpush1.msk.msra.mxu1 %vm35_vm0, %v227_v30  ;;  %218 = vmatmul.mubr.msk.f32.vlgmr.msra.gmra.mrb[0].mxu0 %vm31_vm1, %v14_v31 }
   0xf   :  { %231 = vmatmul.mubr.msk.f32.vlgmr.msra.gmra.mrb[0].mxu1 %vm31_vm1, %v14_v31 }
  0x87   :  { %v29_v32 = vpop.permute.xlu0 %28 }
  0xe1   :  { %v108_v33 = vpop.f32.mrb[0].mxu0 }
  0xe2   :  { %v109_v34 = vadd.f32 %v108_v33, %v29_v32  ;;  %v201_v35 = vpop.f32.mrb[0].mxu1  ;;  %v110_v36 = vpop.f32.mrb[1].mxu0 }
  0xe3   :  { %v202_v37 = vadd.f32 %v201_v35, %v29_v32  ;;  %v111_v38 = vadd.f32 %v110_v36, %v29_v32  ;;  %v203_v39 = vpop.f32.mrb[1].mxu1 }
  0xe4   :  { %v204_v40 = vadd.f32 %v203_v39, %v29_v32 }
  0xe5   :  { %v115_v41 = vcombine.low %v109_v34, %v111_v38 }
  0xe6   :  { %v208_v42 = vcombine.low %v202_v37, %v204_v40 }
  0xe7   :  { %117 = vst [vmem:[%s349_s3] sm:$0xff] %v115_v41 }
  0xe8   :  { %232 = vst [vmem:[%s349_s3 + $0x8] sm:$0xff] %v208_v42 }

</bundles_post_ra>
